<compile_context>
chip_gen: v6e
topology: v6e:2x2x1
jax: 0.10.0
libtpu: 0.0.40
codegen_flags: <defaults>
</compile_context>

<pallas_src>
import functools

import jax
import jax.numpy as jnp
from jax.experimental import pallas as pl
from jax.experimental.pallas import tpu as pltpu


def _li_kernel(x_ref, theta_ref, w_ref, diag_ref, o_ref, *scratch,
               tile_f, acc_is_out):
    # x_ref:     (tb, F)      resident activations (f32)
    # theta_ref: (1, F)       resident gate = sigmoid(k*(diag(w)+b)) (f32)
    # w_ref:     (tile_f, tile_f) weight tile, rows = K tile, cols = N tile (bf16)
    # diag_ref:  (1, F)       resident bf16-rounded diag(w), stored f32
    # o_ref:     (tb, tile_f) output N tile (resident across kk)
    # scratch[0]: (tb, F) bf16 gated-activation scratch
    # scratch[1]: (tb, tile_f) f32 accumulator (only when acc_is_out is False)
    xs_ref = scratch[0]
    acc_ref = o_ref if acc_is_out else scratch[1]

    j = pl.program_id(1)
    kk = pl.program_id(2)
    nk = pl.num_programs(2)

    @pl.when(kk == 0)
    def _prologue():
        # Gate the resident x row-block once per (i, j): xs = x * theta (bf16).
        xs_ref[...] = (x_ref[...].astype(jnp.float32) *
                       theta_ref[...]).astype(xs_ref.dtype)
        acc_ref[...] = jnp.zeros_like(acc_ref)

    koff = pl.multiple_of(kk * tile_f, tile_f)
    xs_k = xs_ref[:, pl.ds(koff, tile_f)]                    # (tb, tile_f) bf16

    acc_ref[...] += jnp.dot(xs_k, w_ref[...],
                            preferred_element_type=jnp.float32)

    # Remove self-inhibition: only the diagonal block (kk == j) of w carries
    # diagonal entries.  Subtract xs[:, n] * w[n, n] with the same bf16-rounded
    # operands the MXU saw, so the cancellation is (nearly) exact.
    @pl.when(kk == j)
    def _remove_self_inhibition():
        d = diag_ref[:, pl.ds(koff, tile_f)]                 # (1, tile_f) f32
        acc_ref[...] -= xs_k.astype(jnp.float32) * d

    if not acc_is_out:
        @pl.when(kk == nk - 1)
        def _writeback():
            o_ref[...] = acc_ref[...].astype(o_ref.dtype)


def _pick_tb(batch):
    # Largest divisor of B that is <= 512 and a multiple of 8: keeps MXU rows
    # well fed without letting the resident x block grow unboundedly; fall back
    # to the full batch (full-dim exception) for awkward batch sizes.
    for cand in range(min(batch, 512), 7, -1):
        if batch % cand == 0 and cand % 8 == 0:
            return cand
    return batch


def _vmem_limit_bytes():
    cap = 128 << 20
    try:
        info = pltpu.get_tpu_info()
        cap = int(getattr(info, "vmem_capacity_bytes", cap))
    except Exception:
        pass
    return int(0.75 * cap)   # ~96 MiB on v5e/v6e, ~48 MiB on v7x


def lateral_inhibition(x, w, b, k, *, tb=None, tile_f=None,
                       mxu_dtype=jnp.bfloat16, interpret=False):
    """x: (B, F), w: (F, F), b: (F,), k: scalar."""
    B, F = x.shape
    assert w.shape == (F, F) and b.shape == (F,)

    # ---- O(F) / O(F^2-cast) preprocessing in plain JAX ----
    diag_w = jnp.diagonal(w).astype(jnp.float32)
    theta = jax.nn.sigmoid(jnp.asarray(k, jnp.float32) *
                           (diag_w + b.astype(jnp.float32))).reshape(1, F)
    # bf16-rounded diagonal (matches the MXU operand) kept in f32 for the fix-up.
    diag_rounded = diag_w.astype(mxu_dtype).astype(jnp.float32).reshape(1, F)
    w_mxu = w.astype(mxu_dtype)          # halves the dominant w HBM traffic

    # ---- Tile selection ----
    if tb is None:
        tb = _pick_tb(B)
    assert B % tb == 0 and (tb % 8 == 0 or tb == B)

    if tile_f is None:
        if F % 256 == 0:
            tile_f = 256
        elif F % 128 == 0:
            tile_f = 128
        else:
            tile_f = F                    # small-F full-dim fallback
        # v7x megacore: keep >= 2 blocks on a parallel axis when possible.
        if (F // tile_f) < 2 and (B // tb) < 2 and tile_f > 128 \
                and F % (tile_f // 2) == 0:
            tile_f //= 2
    assert F % tile_f == 0

    nb, nf = B // tb, F // tile_f
    grid = (nb, nf, nf)                  # (batch tiles, N tiles, K tiles)

    out_dtype = x.dtype
    acc_is_out = jnp.dtype(out_dtype) == jnp.dtype(jnp.float32)

    scratch_shapes = [pltpu.VMEM((tb, F), mxu_dtype)]          # gated x
    if not acc_is_out:
        scratch_shapes.append(pltpu.VMEM((tb, tile_f), jnp.float32))

    esize = jnp.dtype(mxu_dtype).itemsize
    cost = pl.CostEstimate(
        flops=2 * B * F * F + 2 * B * F,
        transcendentals=0,                                     # sigmoid hoisted
        bytes_accessed=(B * F * x.dtype.itemsize               # x, once
                        + nb * F * F * esize                   # w per batch tile
                        + B * F * jnp.dtype(out_dtype).itemsize
                        + 2 * F * 4),                          # theta + diag
    )

    kernel = functools.partial(_li_kernel, tile_f=tile_f, acc_is_out=acc_is_out)

    return pl.pallas_call(
        kernel,
        out_shape=jax.ShapeDtypeStruct((B, F), out_dtype),
        grid=grid,
        in_specs=[
            # x: resident per batch tile (constant index over j, kk).
            pl.BlockSpec((tb, F), lambda i, j, kk: (i, 0)),
            # theta, diag(w): resident (1, F) blocks.
            pl.BlockSpec((1, F), lambda i, j, kk: (0, 0)),
            # w: (K tile, N tile).
            pl.BlockSpec((tile_f, tile_f), lambda i, j, kk: (kk, j)),
            pl.BlockSpec((1, F), lambda i, j, kk: (0, 0)),
        ],
        out_specs=pl.BlockSpec((tb, tile_f), lambda i, j, kk: (i, j)),
        scratch_shapes=scratch_shapes,
        compiler_params=pltpu.CompilerParams(
            dimension_semantics=("parallel", "parallel", "arbitrary"),
            vmem_limit_bytes=_vmem_limit_bytes()),
        cost_estimate=cost,
        interpret=interpret,
    )(x, theta, w_mxu, diag_rounded)


def lateral_inhibition_ref(x, w, b, k):
    """Pure-JAX (f32) reference mirroring the PyTorch forward."""
    diag_w = jnp.diag(w)
    w_zero_diag = w - jnp.diag(diag_w)
    theta = jax.nn.sigmoid(k * (diag_w + b))
    return (x * theta) @ w_zero_diag


if __name__ == "__main__":
    batch = 16
    num_features = 256   # with the default tiling this exercises a (1,2,2) grid
    k = 0.5

    key = jax.random.PRNGKey(0)
    kx, kw, kb = jax.random.split(key, 3)
    x = jax.random.normal(kx, (batch, num_features), dtype=jnp.float32)
    w = jax.random.normal(kw, (num_features, num_features), dtype=jnp.float32)
    b = jax.random.normal(kb, (num_features,), dtype=jnp.float32)

    li = jax.jit(lateral_inhibition)
    out = jax.block_until_ready(li(x, w, b, k))
    ref = lateral_inhibition_ref(x, w, b, k)

    assert out.shape == ref.shape
    # bf16 MXU operands (f32 accumulate) -> tolerance is bf16-level, not f32-exact.
    max_err = float(jnp.max(jnp.abs(out - ref)))
    rel_err = float(jnp.linalg.norm(out - ref) / jnp.linalg.norm(ref))
    assert max_err < 0.5 and rel_err < 1e-2, (max_err, rel_err)

    # Same compiled kernel reused with a different k (traced scalar -> no retrace).
    out2 = jax.block_until_ready(li(x, w, b, 1.25))
    ref2 = lateral_inhibition_ref(x, w, b, 1.25)
    rel2 = float(jnp.linalg.norm(out2 - ref2) / jnp.linalg.norm(ref2))
    assert rel2 < 1e-2, rel2

    print("KERNEL_OK")
</pallas_src>

<mosaic_0001>
module attributes {stable_mosaic.version = 11 : i64} {
  func.func @_li_kernel(%arg0: i32, %arg1: i32, %arg2: i32, %arg3: memref<16x256xf32, #tpu.memory_space<vmem>>, %arg4: memref<1x256xf32, #tpu.memory_space<vmem>>, %arg5: memref<128x128xbf16, #tpu.memory_space<vmem>>, %arg6: memref<1x256xf32, #tpu.memory_space<vmem>>, %arg7: memref<16x128xf32, #tpu.memory_space<vmem>>, %arg8: memref<16x256xbf16, #tpu.memory_space<vmem>>) attributes {dimension_semantics = [#tpu.dimension_semantics<parallel>, #tpu.dimension_semantics<parallel>, #tpu.dimension_semantics<arbitrary>], iteration_bounds = array<i64: 1, 2, 2>, scalar_prefetch = 0 : i64, scratch_operands = 1 : i64, tpu.core_type = #tpu.core_type<tc>, window_params = [{transform_indices = @transform_0, window_bounds = array<i64: 16, 256>}, {pipeline_mode = #tpu.pipeline_mode<synchronous>, transform_indices = @transform_1, window_bounds = array<i64: 1, 256>}, {transform_indices = @transform_2, window_bounds = array<i64: 128, 128>}, {pipeline_mode = #tpu.pipeline_mode<synchronous>, transform_indices = @transform_3, window_bounds = array<i64: 1, 256>}, {transform_indices = @transform_4, window_bounds = array<i64: 16, 128>}]} {
    %c0_i32 = arith.constant 0 : i32
    %0 = arith.cmpi eq, %arg2, %c0_i32 : i32
    %1 = arith.extui %0 : i1 to i32
    %c0_i32_0 = arith.constant 0 : i32
    %2 = arith.cmpi ne, %1, %c0_i32_0 : i32
    scf.if %2 {
      %c0_8 = arith.constant 0 : index
      %c0_9 = arith.constant 0 : index
      %15 = vector.load %arg3[%c0_8, %c0_9] : memref<16x256xf32, #tpu.memory_space<vmem>>, vector<16x256xf32>
      %c0_10 = arith.constant 0 : index
      %c0_11 = arith.constant 0 : index
      %16 = vector.load %arg4[%c0_10, %c0_11] : memref<1x256xf32, #tpu.memory_space<vmem>>, vector<1x256xf32>
      %17 = vector.broadcast %16 : vector<1x256xf32> to vector<16x256xf32>
      %18 = arith.mulf %15, %17 : vector<16x256xf32>
      %19 = arith.truncf %18 : vector<16x256xf32> to vector<16x256xbf16>
      %c0_12 = arith.constant 0 : index
      %c0_13 = arith.constant 0 : index
      %20 = vector.load %arg8[%c0_12, %c0_13] : memref<16x256xbf16, #tpu.memory_space<vmem>>, vector<16x256xbf16>
      tpu.vector_store %arg8[%c0_12, %c0_13], %19 {strides = array<i32>} : memref<16x256xbf16, #tpu.memory_space<vmem>>, vector<16x256xbf16>,
      %cst_14 = arith.constant 0.000000e+00 : f32
      %21 = vector.broadcast %cst_14 : f32 to vector<16x128xf32>
      %c0_15 = arith.constant 0 : index
      %c0_16 = arith.constant 0 : index
      %22 = vector.load %arg7[%c0_15, %c0_16] : memref<16x128xf32, #tpu.memory_space<vmem>>, vector<16x128xf32>
      tpu.vector_store %arg7[%c0_15, %c0_16], %21 {strides = array<i32>} : memref<16x128xf32, #tpu.memory_space<vmem>>, vector<16x128xf32>,
    } else {
    }
    %c128_i32 = arith.constant 128 : i32
    %3 = arith.muli %arg2, %c128_i32 : i32
    %4 = tpu.assume_multiple %3, 128 : i32
    %c0 = arith.constant 0 : index
    %5 = arith.index_cast %4 : i32 to index
    %6 = vector.load %arg8[%c0, %5] : memref<16x256xbf16, #tpu.memory_space<vmem>>, vector<16x128xbf16>
    %c0_1 = arith.constant 0 : index
    %c0_2 = arith.constant 0 : index
    %7 = vector.load %arg7[%c0_1, %c0_2] : memref<16x128xf32, #tpu.memory_space<vmem>>, vector<16x128xf32>
    %c0_3 = arith.constant 0 : index
    %c0_4 = arith.constant 0 : index
    %8 = vector.load %arg5[%c0_3, %c0_4] : memref<128x128xbf16, #tpu.memory_space<vmem>>, vector<128x128xbf16>
    %cst = arith.constant dense<0.000000e+00> : vector<16x128xf32>
    %9 = tpu.matmul %6, %8, %cst {dimension_numbers = #tpu.dot_dimension_numbers<[1], [0], [0], [1], [0, 0, 1, 1], [], []>} : vector<16x128xbf16>, vector<128x128xbf16>, vector<16x128xf32> -> vector<16x128xf32>
    %10 = arith.addf %7, %9 : vector<16x128xf32>
    %c0_5 = arith.constant 0 : index
    %c0_6 = arith.constant 0 : index
    %11 = vector.load %arg7[%c0_5, %c0_6] : memref<16x128xf32, #tpu.memory_space<vmem>>, vector<16x128xf32>
    tpu.vector_store %arg7[%c0_5, %c0_6], %10 {strides = array<i32>} : memref<16x128xf32, #tpu.memory_space<vmem>>, vector<16x128xf32>,
    %12 = arith.cmpi eq, %arg2, %arg1 : i32
    %13 = arith.extui %12 : i1 to i32
    %c0_i32_7 = arith.constant 0 : i32
    %14 = arith.cmpi ne, %13, %c0_i32_7 : i32
    scf.if %14 {
      %c0_8 = arith.constant 0 : index
      %15 = arith.index_cast %4 : i32 to index
      %16 = vector.load %arg6[%c0_8, %15] : memref<1x256xf32, #tpu.memory_space<vmem>>, vector<1x128xf32>
      %c0_9 = arith.constant 0 : index
      %c0_10 = arith.constant 0 : index
      %17 = vector.load %arg7[%c0_9, %c0_10] : memref<16x128xf32, #tpu.memory_space<vmem>>, vector<16x128xf32>
      %18 = arith.extf %6 : vector<16x128xbf16> to vector<16x128xf32>
      %19 = vector.broadcast %16 : vector<1x128xf32> to vector<16x128xf32>
      %20 = arith.mulf %18, %19 : vector<16x128xf32>
      %21 = arith.subf %17, %20 : vector<16x128xf32>
      %c0_11 = arith.constant 0 : index
      %c0_12 = arith.constant 0 : index
      %22 = vector.load %arg7[%c0_11, %c0_12] : memref<16x128xf32, #tpu.memory_space<vmem>>, vector<16x128xf32>
      tpu.vector_store %arg7[%c0_11, %c0_12], %21 {strides = array<i32>} : memref<16x128xf32, #tpu.memory_space<vmem>>, vector<16x128xf32>,
    } else {
    }
    return
  }
  func.func @transform_0(%arg0: i32, %arg1: i32, %arg2: i32) -> (i32, i32) {
    %c0_i32 = arith.constant 0 : i32
    %c0_i32_0 = arith.constant 0 : i32
    return %arg0, %c0_i32 : i32, i32
  }
  func.func @transform_1(%arg0: i32, %arg1: i32, %arg2: i32) -> (i32, i32) {
    %c0_i32 = arith.constant 0 : i32
    %c0_i32_0 = arith.constant 0 : i32
    %c0_i32_1 = arith.constant 0 : i32
    return %c0_i32, %c0_i32_0 : i32, i32
  }
  func.func @transform_2(%arg0: i32, %arg1: i32, %arg2: i32) -> (i32, i32) {
    %c0_i32 = arith.constant 0 : i32
    return %arg2, %arg1 : i32, i32
  }
  func.func @transform_3(%arg0: i32, %arg1: i32, %arg2: i32) -> (i32, i32) {
    %c0_i32 = arith.constant 0 : i32
    %c0_i32_0 = arith.constant 0 : i32
    %c0_i32_1 = arith.constant 0 : i32
    return %c0_i32, %c0_i32_0 : i32, i32
  }
  func.func @transform_4(%arg0: i32, %arg1: i32, %arg2: i32) -> (i32, i32) {
    %c0_i32 = arith.constant 0 : i32
    return %arg0, %arg1 : i32, i32
  }
}

</mosaic_0001>

<bundles_post_ra>
// kernel: lateral_inhibition.1
= control target key start
LH: loop header
LB: loop body
LE: loop exit
PB: predicated region body
PF: predicated region fallthrough
CT: control target
= control target key end

     0   :  { %s1206_s0 = inlined_call_operand.vmem [shape: f32[16,256], index: 0, kind: input, shape index: {}]   ;;  %s1207_s1 = inlined_call_operand.vmem [shape: f32[1,256], index: 1, kind: input, shape index: {}]   ;;  %s1208_s2 = inlined_call_operand.vmem [shape: bf16[256,256], index: 2, kind: input, shape index: {}]   ;;  %s1209_s3 = inlined_call_operand.vmem [shape: f32[1,256], index: 3, kind: input, shape index: {}]   ;;  %s1210_s4 = inlined_call_operand.hbm [shape: f32[16,256], index: 4, kind: output, shape index: {}]  }
   0x1   :  { %1212 = sst [smem:[#allocation7_spill]] %s1208_s2 }
   0x2   :  { %9 = vsyncpa [#allocation5], 0 }
   0x3   :  { %11 = vsyncpa [#allocation5 + $0x1], 0  ;;  %s967_s15 = smov 0   ;;  %s969_s16 = smov 0  }
   0x4   :  { %s971_s17 = smov 0   ;;  %s973_s18 = smov 0  }
   0x5   :  { %s975_s19 = smov 0   ;;  %s977_s20 = smov 0  }
   0x6   :  { %s979_s21 = smov 0   ;;  %s981_s22 = smov 0  }
   0x7   :  { %s983_s23 = smov 0   ;;  %s985_s24 = smov 0  }
   0x8 LB: > { %s659_s25 = sadd.s32 4294967295, %s933_s24   ;;  %s660_s26 = sadd.s32 4294967294, %s933_s24   ;;  %s933_s24 = sphi %s985_s24, %s17_s24   ;;  %s929_s23 = sphi %s983_s23, %s1226_s23   ;;  %s925_s22 = sphi %s981_s22, %s1225_s22   ;;  %s921_s21 = sphi %s979_s21, %s1224_s21   ;;  %s917_s20 = sphi %s977_s20, %s1223_s20   ;;  %s913_s19 = sphi %s975_s19, %s1222_s19   ;;  %s909_s18 = sphi %s973_s18, %s1221_s18   ;;  %s905_s17 = sphi %s971_s17, %s1220_s17   ;;  %s901_s16 = sphi %s969_s16, %s1219_s16   ;;  %s897_s15 = sphi %s967_s15, %s1218_s15  }
   0x9   : > { %s29_s27 = sadd.s32 1, %s925_s22  ;;  %s32_s28 = sadd.s32 1, %s929_s23 }
   0xa   : > { %p30_p0 = scmp.ge.s32.totalorder %s29_s27, 2  ;;  %s92_s29 = sadd.s32 1, %s913_s19 }
   0xb   : > { %p99_p1 = scmp.ne.s32.totalorder %s913_s19, %s909_s18  ;;  %p100_p2 = scmp.eq.s32.totalorder %s933_s24, 0 }
   0xc   : > { %s1228_s27 = smov (%p30_p0, %s29_s27), 0  ;;  %s1230_s28 = smov (!%p30_p0, %s32_s28), %s929_s23 }
   0xd   : > { %s87_s30 = ssub.s32 %s925_s22, %s1228_s27  ;;  %p1030_p3 = por %p100_p2, %p99_p1 }
   0xe   : > { %p34_p4 = scmp.ge.s32.totalorder %s1230_s28, 2  ;;  %s141_s6 = sadd.s32 1, %s905_s17 }
   0xf   : > { %p151_p5 = scmp.ne.s32.totalorder %s905_s17, %s901_s16  ;;  %p152_p6 = scmp.eq.s32.totalorder %s659_s25, 3 }
  0x10   : > { %s1232_s28 = smov (%p34_p4, %s1230_s28), 0  ;;  %p157_p8 = scmp.ne.s32.totalorder %s901_s16, %s897_s15 }
  0x11   : > { %p1039_p7 = por %p152_p6, %p151_p5  ;;  %s88_s8 = ssub.s32 %s929_s23, %s1232_s28 }
  0x12   : > { %p158_p9 = scmp.eq.s32.totalorder %s660_s26, 3  ;;  %s89_s9 = sor.u32 %s88_s8, %s87_s30 }
  0x13   : > { %p139_p10 = scmp.eq.s32.totalorder %s88_s8, 0  ;;  %p90_p11 = scmp.eq.s32.totalorder %s89_s9, 0 }
  0x14   : > { %p1047_p12 = por %p158_p9, %p157_p8  ;;  %p663_p13 = scmp.ge.s32.totalorder %s933_s24, 4 }
  0x15   : > { %s1052_s11 = scalar_select %p139_p10, %s905_s17, %s141_s6  }
  0x16   : > { %s1055_s12 = scalar_select %p90_p11, %s913_s19, %s92_s29  }
  0x17   : > { %190 = sbr.rel (%p663_p13) target bundleno = 48 (0x30), region = 28 }
  0x1c   : > { %193 = sbr.rel (!%p1030_p3) target bundleno = 48 (0x30), region = 32  ;;  %s195_s13 = sand.u32 (%p1030_p3), 1, %s913_s19  }
  0x1d   : > { %s691_s14 = sshll.u32 (%p1030_p3), %s925_s22, 5  ;;  %s664_s25 = sshll.u32 (%p1030_p3), %s195_s13, 6 }
  0x1e   : > { %s200_s26 = sadd.s32 (%p1030_p3), %s929_s23, %s691_s14  ;;  %s1216_s2 = sld [smem:[#allocation7_spill]] (%p1030_p3) }
  0x1f   : > { %s667_s30 = sshll.u32 (%p1030_p3), %s200_s26, 2  ;;  %s197_s29 = scalar_lea.vmem (%p1030_p3), [#allocation3], %s664_s25 }
  0x24   : > { %s1066_s6 = scalar_lea.vmem %s1216_s2, %s667_s30 }
  0x25   : > { %v219_v0 = vld [vmem:[%s1066_s6] sm:$0xf]  ;;  %v221_v1 = vld [vmem:[%s1066_s6 + $0x8] sm:$0xf]  ;;  %v223_v2 = vld [vmem:[%s1066_s6 + $0x10] sm:$0xf] }
  0x26   : > { %220 = vst [vmem:[%s197_s29] sm:$0xf] %v219_v0  ;;  %222 = vst [vmem:[%s197_s29 + $0x4] sm:$0xf] %v221_v1  ;;  %v225_v3 = vld [vmem:[%s1066_s6 + $0x18] sm:$0xf] }
  0x27   : > { %224 = vst [vmem:[%s197_s29 + $0x8] sm:$0xf] %v223_v2  ;;  %v227_v4 = vld [vmem:[%s1066_s6 + $0x20] sm:$0xf]  ;;  %v229_v5 = vld [vmem:[%s1066_s6 + $0x28] sm:$0xf] }
  0x28   : > { %226 = vst [vmem:[%s197_s29 + $0xc] sm:$0xf] %v225_v3  ;;  %228 = vst [vmem:[%s197_s29 + $0x10] sm:$0xf] %v227_v4  ;;  %v231_v6 = vld [vmem:[%s1066_s6 + $0x30] sm:$0xf] }
  0x29   : > { %230 = vst [vmem:[%s197_s29 + $0x14] sm:$0xf] %v229_v5  ;;  %v233_v7 = vld [vmem:[%s1066_s6 + $0x38] sm:$0xf]  ;;  %v235_v8 = vld [vmem:[%s1066_s6 + $0x40] sm:$0xf] }
  0x2a   : > { %232 = vst [vmem:[%s197_s29 + $0x18] sm:$0xf] %v231_v6  ;;  %234 = vst [vmem:[%s197_s29 + $0x1c] sm:$0xf] %v233_v7  ;;  %v237_v9 = vld [vmem:[%s1066_s6 + $0x48] sm:$0xf] }
  0x2b   : > { %236 = vst [vmem:[%s197_s29 + $0x20] sm:$0xf] %v235_v8  ;;  %v239_v10 = vld [vmem:[%s1066_s6 + $0x50] sm:$0xf]  ;;  %v241_v11 = vld [vmem:[%s1066_s6 + $0x58] sm:$0xf] }
  0x2c   : > { %238 = vst [vmem:[%s197_s29 + $0x24] sm:$0xf] %v237_v9  ;;  %240 = vst [vmem:[%s197_s29 + $0x28] sm:$0xf] %v239_v10  ;;  %v243_v12 = vld [vmem:[%s1066_s6 + $0x60] sm:$0xf] }
  0x2d   : > { %242 = vst [vmem:[%s197_s29 + $0x2c] sm:$0xf] %v241_v11  ;;  %v245_v13 = vld [vmem:[%s1066_s6 + $0x68] sm:$0xf]  ;;  %v247_v14 = vld [vmem:[%s1066_s6 + $0x70] sm:$0xf] }
  0x2e   : > { %244 = vst [vmem:[%s197_s29 + $0x30] sm:$0xf] %v243_v12  ;;  %246 = vst [vmem:[%s197_s29 + $0x34] sm:$0xf] %v245_v13  ;;  %v249_v15 = vld [vmem:[%s1066_s6 + $0x78] sm:$0xf] }
  0x2f   : > { %248 = vst [vmem:[%s197_s29 + $0x38] sm:$0xf] %v247_v14  ;;  %250 = vst [vmem:[%s197_s29 + $0x3c] sm:$0xf] %v249_v15 }
  0x30 PF: > { %p668_p0 = scmp.ge.s32.totalorder %s933_s24, 1  ;;  %p305_p1 = scmp.lt.s32.totalorder %s933_s24, 5 }
  0x32   : > { %p306_p2 = pnand %p668_p0, %p305_p1 }
  0x33   : > { %s312_s5 = sand.u32 (!%p306_p2), 1, %s909_s18   ;;  %s1211_s13 = sand.u32 (!%p306_p2), 1, %s901_s16  }
  0x34   : > { %309 = sbr.rel (%p306_p2) target bundleno = 344 (0x158), region = 73  ;;  %s669_s14 = sshll.u32 (!%p306_p2), %s312_s5, 6 }
  0x35   : > { %s670_s25 = sshll.u32 (!%p306_p2), %s1211_s13, 4  ;;  %s1090_s26 = scalar_lea.vmem (!%p306_p2), [#allocation3], %s669_s14 }
  0x36   : > { %s1092_s30 = scalar_lea.vmem (!%p306_p2), [#allocation4], %s670_s25  ;;  %p671_p3 = scmp.ne.s32.totalorder (!%p306_p2), %s917_s20, 0 }
  0x39   : > { %356 = sbr.rel (%p671_p3) target bundleno = 75 (0x4b), region = 81 }
  0x3e   : > { %v363_v16 = vlaneseq  ;;  %v935_v17 = vmov 0.0   ;;  %v361_v19 = vld [vmem:[%s1207_s1] sm:$0x3]  ;;  %v358_v23 = vld [vmem:[%s1206_s0 + $0x8] sm:$0xff]  ;;  %v359_v24 = vld [vmem:[%s1206_s0 + $0x10] sm:$0xff] }
  0x3f   : > { %391 = vst [vmem:[%s1092_s30] sm:$0xff] %v935_v17  ;;  %392 = vst [vmem:[%s1092_s30 + $0x8] sm:$0xff] %v935_v17  ;;  %v357_v20 = vld [vmem:[%s1206_s0] sm:$0xff]  ;;  %v360_v25 = vld [vmem:[%s1206_s0 + $0x18] sm:$0xff] }
  0x40   : > { %v364_v18 = vshrl.u32 %v363_v16, 7 }
  0x42   : > { %v365_v21 = vsub.s32 0, %v364_v18  ;;  %v369_v22 = vsub.s32 1, %v364_v18 }
  0x44   : > { %v366_v26 = vrot.slane %v361_v19, %v365_v21  ;;  %v370_v27 = vrot.slane %v361_v19, %v369_v22 }
  0x46   : > { %v373_v28 = vmul.f32 %v366_v26, %v357_v20  ;;  %v374_v29 = vmul.f32 %v370_v27, %v358_v23  ;;  %v375_v30 = vmul.f32 %v366_v26, %v359_v24  ;;  %v376_v31 = vmul.f32 %v370_v27, %v360_v25 }
  0x48   : > { %v692_v32 = vpack.c.bf16 %v374_v29, %v373_v28  ;;  %v693_v33 = vpack.c.bf16 %v376_v31, %v375_v30 }
  0x4a   : > { %389 = vst [vmem:[#allocation2] sm:$0xff] %v692_v32  ;;  %390 = vst [vmem:[#allocation2 + $0x8] sm:$0xff] %v693_v33 }
  0x4b PF: > { %v816_v34 = vld [vmem:[%s1090_s26 + $0x38] sm:$0xff]   ;;  %v936_v35 = vmov 0.0   ;;  %v817_v36 = vld [vmem:[%s1090_s26 + $0x30] sm:$0xff]   ;;  %vm937_vm0 = vmmov 0   ;;  %v818_v37 = vld [vmem:[%s1090_s26 + $0x28] sm:$0xff]   ;;  %s674_s2 = sshll.u32 %s917_s20, 7  ;;  %p685_p4 = scmp.ne.s32.totalorder %s917_s20, %s921_s21 }
  0x4c   : > { %703 = vmatprep.subr.bf16.mxu0 %v936_v35  ;;  %719 = vmatprep.mubr.msk.bf16.mxu0 %vm937_vm0, %v936_v35  ;;  %v819_v38 = vld [vmem:[%s1090_s26 + $0x20] sm:$0xff]   ;;  %v820_v39 = vld [vmem:[%s1090_s26 + $0x18] sm:$0xff]   ;;  %s1118_s13 = sshra.s32 %s674_s2, 7  ;;  %v821_v40 = vld [vmem:[%s1090_s26 + $0x10] sm:$0xff]  }
  0x4d   : > { %704 = vmatpush3.bf16.msra.mxu0 %v816_v34  ;;  %s675_s8 = sshll.u32 %s1118_s13, 2  ;;  %v822_v41 = vld [vmem:[%s1090_s26 + $0x8] sm:$0xff]   ;;  %v823_v42 = vld [vmem:[%s1090_s26] sm:$0xff]   ;;  %s521_s6 = scalar_lea.vmem (!%p685_p4), %s1209_s3, %s1118_s13 }
  0x4e   : > { %705 = vmatprep.subr.bf16.mxu0 %v936_v35  ;;  %s397_s18 = scalar_lea.vmem [#allocation2], %s675_s8  ;;  %v400_v46 = vld [vmem:[%s1092_s30] sm:$0xff]  ;;  %v401_v50 = vld [vmem:[%s1092_s30 + $0x8] sm:$0xff] }
  0x51   : > { %706 = vmatpush3.bf16.msra.mxu0 %v817_v36  ;;  %v398_v43 = vld [vmem:[%s397_s18] sm:$0xf]  ;;  %v399_v44 = vld [vmem:[%s397_s18 + $0x8] sm:$0xf] }
  0x52   : > { %707 = vmatprep.subr.bf16.mxu0 %v936_v35  ;;  %v676_v45 = vcombine.low %v398_v43, %v399_v44 }
  0x55   : > { %708 = vmatpush3.bf16.msra.mxu0 %v818_v37 }
  0x56   : > { %709 = vmatprep.subr.bf16.mxu0 %v936_v35 }
  0x59   : > { %710 = vmatpush3.bf16.msra.mxu0 %v819_v38 }
  0x5a   : > { %711 = vmatprep.subr.bf16.mxu0 %v936_v35 }
  0x5d   : > { %712 = vmatpush3.bf16.msra.mxu0 %v820_v39 }
  0x5e   : > { %713 = vmatprep.subr.bf16.mxu0 %v936_v35 }
  0x61   : > { %714 = vmatpush3.bf16.msra.mxu0 %v821_v40 }
  0x62   : > { %715 = vmatprep.subr.bf16.mxu0 %v936_v35 }
  0x65   : > { %716 = vmatpush3.bf16.msra.mxu0 %v822_v41 }
  0x66   : > { %717 = vmatprep.subr.bf16.mxu0 %v936_v35 }
  0x69   : > { %718 = vmatpush3.bf16.msra.mxu0 %v823_v42 }
  0x6c   : > { %720 = vmatmul.mubr.bf16.vlgmr.msra.gmra.mxu0 %v676_v45 }
 0x12c   : > { %v506_v47 = vpop.f32.mrf.mxu0 }
 0x12d   : > { %v513_v48 = vadd.f32 %v506_v47, %v400_v46 }
 0x12e   : > { %v721_v49 = vpop.f32.mrf.mxu0 }
 0x12f   : > { %515 = vst [vmem:[%s1092_s30] sm:$0xff] %v513_v48  ;;  %520 = sbr.rel (%p685_p4) target bundleno = 318 (0x13e), region = 85 }
 0x130   : > { %v509_v51 = vpop.f32.mrf.mxu0 }
 0x131   : > { %v514_v52 = vadd.f32 %v509_v51, %v401_v50 }
 0x132   : > { %v722_v53 = vpop.f32.mrf.mxu0 }
 0x133   : > { %516 = vst [vmem:[%s1092_s30 + $0x8] sm:$0xff] %v514_v52 }
 0x134   : > { %v525_v54 = vunpack.c.l.bf16 %v398_v43  ;;  %v526_v55 = vunpack.c.l.bf16 %v399_v44  ;;  %v686_v56 = vld [vmem:[%s521_s6] ss:$0 sm:$0xff] }
 0x136   : > { %v523_v57 = vld [vmem:[%s1092_s30] sm:$0xff]  ;;  %v533_v59 = vmul.f32 %v686_v56, %v525_v54  ;;  %v534_v60 = vmul.f32 %v686_v56, %v526_v55 }
 0x138   : > { %v535_v61 = vsub.f32 %v523_v57, %v533_v59 }
 0x13a   : > { %v524_v58 = vld [vmem:[%s1092_s30 + $0x8] sm:$0xff]  ;;  %537 = vst [vmem:[%s1092_s30] sm:$0xff] %v535_v61 }
 0x13b   : > { %v536_v62 = vsub.f32 %v524_v58, %v534_v60 }
 0x13d   : > { %538 = vst [vmem:[%s1092_s30 + $0x8] sm:$0xff] %v536_v62 }
 0x13e PF: > { %s688_s20 = sshll.u32 %s921_s21, 7  ;;  %s555_s25 = sshll.u32 %s1092_s30, 4  ;;  %s1145_s25 = int_to_ptr.vmem [resolvable:$true] %s555_s25 }
 0x13f   : > { %s1142_s14 = scalar_lea.hbm %s1210_s4, %s688_s20  ;;  %s1217_s2 = sand.u32 1, %s901_s16  }
 0x140   : > { %s1149_s13 = scalar_lea.sflag [#allocation5], %s1217_s2  ;;  %s825_s8 = scalar_lea.vmem %s1145_s25, 256 }
 0x141   : > { %p826_p5 = scmp.ne.s32.totalorder %s1145_s25, %s825_s8  ;;  %s938_s21 = smov [#allocation4]  }
 0x142   : > { %s829_s18 = sshll.u32 %s938_s21, 4  ;;  %s830_s18 = int_to_ptr.vmem [resolvable:$false] %s829_s18 }
 0x143   : > { %p827_p6 = pnand %p826_p5, %p1039_p7  ;;  %s831_s26 = scalar_lea.vmem %s830_s18, 512 }
 0x144   : > { %p832_p9 = scmp.lt.s32.totalorder %s1145_s25, %s830_s18  ;;  %p833_p10 = scmp.lt.s32.totalorder %s831_s26, %s825_s8 }
 0x145   : > { %p828_p8 = pneg %p827_p6 }
 0x146   : > { %p834_p11 = por %p833_p10, %p832_p9 }
 0x148   : > { %p835_p13 = pnand %p834_p11, %p828_p8 }
 0x14a   : > { %838 = shalt.err (!%p835_p13)
}
 0x14b   : > { %s839_s30 = scalar_lea.hbm %s1142_s14, 256  ;;  %s843_s20 = scalar_lea.hbm %s1210_s4, 512 }
 0x14c   : > { %p840_p0 = scmp.ne.s32.totalorder %s1142_s14, %s839_s30  ;;  %p844_p3 = scmp.lt.s32.totalorder %s1142_s14, %s1210_s4 }
 0x14d   : > { %p845_p4 = scmp.lt.s32.totalorder %s843_s20, %s839_s30 }
 0x14e   : > { %p841_p1 = pnand %p840_p0, %p1039_p7 }
 0x14f   : > { %p846_p5 = por %p845_p4, %p844_p3 }
 0x150   : > { %p842_p2 = pneg %p841_p1 }
 0x152   : > { %p847_p6 = pnand %p846_p5, %p842_p2 }
 0x154   : > { %850 = shalt.err (!%p847_p6)
}
 0x155   : > { %s939_s2 = smov 128   ;;  %s940_s8 = smov 256  }
 0x156   : > { %s941_s21 = smov 8  }
 0x157   : > { %723 = dma.vmem_to_hbm [thread:$0]  (%p1039_p7), %s1145_s25, 256, %s1142_s14, %s1149_s13, %s939_s2, %s940_s8, %s941_s21  }
 0x158 PF: > { %p729_p8 = scmp.ge.s32.totalorder %s933_s24, 2  ;;  %s570_s18 = sand.u32 1, %s897_s15  }
 0x159   : > { %s571_s26 = scalar_lea.sflag [#allocation5], %s570_s18 }
 0x15a   : > { %p726_p9 = pnand %p729_p8, %p1047_p12 }
 0x15c   : > { %p727_p10 = pneg %p726_p9 }
 0x15e   : > { %892 = dma.done.wait (%p727_p10), %s571_s26, 256  }
 0x15f   : > { %894 = vsyncadd (%p727_p10), %s571_s26, 4294967040  ;;  %s17_s24 = sadd.s32 1, %s933_s24   ;;  %s1218_s15 = smov %s901_s16 }
 0x160   : > { %p14_p11 = scmp.ge.s32.totalorder %s17_s24, 6   ;;  %s1219_s16 = smov %s905_s17 }
 0x161   : > { %s1220_s17 = smov %s1052_s11  ;;  %s1221_s18 = smov %s913_s19 }
 0x162   : > { %s1222_s19 = smov %s1055_s12  ;;  %s1223_s20 = smov %s925_s22 }
 0x163   : > { %s1224_s21 = smov %s929_s23  ;;  %s1225_s22 = smov %s1228_s27 }
 0x164   : > { %s1226_s23 = smov %s1232_s28  ;;  %16 = sbr.rel (!%p14_p11) target bundleno = 8 (0x8), region = 130 }
 0x169   :  { %576 = vsyncpa [#allocation5], 1 }
 0x16a   :  { %578 = vsyncpa [#allocation5 + $0x1], 1 }

</bundles_post_ra>
